<compile_context>
chip_gen: v7x
topology: tpu7x:2x2x1
jax: 0.10.0
libtpu: 0.0.40
codegen_flags: <defaults>
</compile_context>

<pallas_src>
import functools
import math

import jax
import jax.numpy as jnp
from jax.experimental import pallas as pl
from jax.experimental.pallas import tpu as pltpu


def _edge_loss_kernel(x_ref, y_ref, o_ref, *, h, w, total_rows, ragged):
    """One block of whole planes stacked as a (bh, w) tile.

    Writes sum(d^2 + 0.5*(gx^2 + gy^2)) over the valid rows of the block into
    o_ref (1, 1, 1), where d = x - y and gx/gy are the Sobel responses of d
    (linearity of the stencil).
    """
    # f32 math throughout; astype is a no-op for f32 inputs.
    d = x_ref[...].astype(jnp.float32) - y_ref[...].astype(jnp.float32)
    bh = d.shape[0]

    # Skinny boundary masks: (bh,1) row predicate, (1,w) column predicate.
    # They broadcast inside the selects -> no full-tile int temporaries.
    row = jax.lax.broadcasted_iota(jnp.int32, (bh, 1), 0)
    col = jax.lax.broadcasted_iota(jnp.int32, (1, w), 1)
    r_in_plane = row % h
    not_top = r_in_plane != 0
    not_bot = r_in_plane != (h - 1)
    not_left = col != 0
    not_right = col != (w - 1)

    # Vertical (sublane) pass: neighbours one row above/below, zeroed at the
    # top/bottom edge of every plane (== F.conv2d zero padding).  Wrap-around
    # rows are always masked because blocks start/end on plane boundaries.
    up = jnp.where(not_top, pltpu.roll(d, 1, axis=0), 0.0)         # d[i-1, j]
    down = jnp.where(not_bot, pltpu.roll(d, bh - 1, axis=0), 0.0)  # d[i+1, j]

    # --- gx path (sobel_x = [[1,0,-1],[2,0,-2],[1,0,-1]]), consumed fully
    # before the gy temporaries are created (lower peak VMEM/vreg pressure).
    v1 = up + 2.0 * d + down                                         # smoothing
    v1_l = jnp.where(not_left, pltpu.roll(v1, 1, axis=1), 0.0)       # v1[i, j-1]
    v1_r = jnp.where(not_right, pltpu.roll(v1, w - 1, axis=1), 0.0)  # v1[i, j+1]
    gx = v1_l - v1_r
    acc = d * d + 0.5 * (gx * gx)

    # --- gy path (sobel_y = [[1,2,1],[0,0,0],[-1,-2,-1]]).
    v2 = up - down                                                   # difference
    v2_l = jnp.where(not_left, pltpu.roll(v2, 1, axis=1), 0.0)
    v2_r = jnp.where(not_right, pltpu.roll(v2, w - 1, axis=1), 0.0)
    gy = v2_l + 2.0 * v2 + v2_r
    acc = acc + 0.5 * (gy * gy)

    if ragged:
        # The last block may read past the array: those rows hold garbage.
        # They never leak into valid rows (plane-edge rolls are masked above),
        # so a NaN-safe select BEFORE the sum is sufficient.
        valid = (pl.program_id(0) * bh + row) < total_rows
        acc = jnp.where(valid, acc, 0.0)

    o_ref[...] = jnp.sum(acc).reshape(1, 1, 1)


def _vmem_capacity_bytes():
    try:
        info = pltpu.get_tpu_info()
        cap = int(getattr(info, "vmem_capacity_bytes", 0))
        if cap > 0:
            return cap
    except Exception:
        pass
    return 64 * 1024 * 1024   # conservative (v7x per-TensorCore)


def edge_loss(x, y, *, block_planes=None):
    """EdgeLoss.forward with criterion = MSE (mean reduction).

    x, y: NCHW arrays (N, C, H, W); the original grouped conv requires C == N.
    Returns a scalar float32 loss.
    """
    N, C, H, W = x.shape
    assert y.shape == x.shape
    assert C == N, "original module uses groups=batch_size -> channels must equal batch"
    NC = N * C

    # Stack all planes along the sublane axis (metadata-only reshape, no copy,
    # input dtype preserved for the DMA).
    x2 = x.reshape(NC * H, W)
    y2 = y.reshape(NC * H, W)

    itemsize = jnp.dtype(x.dtype).itemsize
    plane_bytes = H * W * itemsize
    # Native sublane tile of the input dtype (8 f32 / 16 bf16 / 32 int8):
    # base-aligned block row counts avoid packed-sublane relayout.
    sublane = max(8, 32 // itemsize)
    base = sublane // math.gcd(sublane, H)

    vmem_cap = _vmem_capacity_bytes()
    if block_planes is None:
        # Per-input per-pipeline-buffer budget.  Sized so 2 inputs x 2 buffers
        # plus ~6 live f32 full-tile temporaries stay well under the VMEM
        # limit on every generation (including v7x's 64 MiB/TC).
        budget = (2 if vmem_cap > (64 << 20) else 1) * 1024 * 1024
        block_planes = max(1, budget // plane_bytes)

    b = min(NC, int(block_planes))
    if b < NC:
        b = max(base, (b // base) * base)
    # Megacore: keep at least 2 grid steps when the plane count allows it so
    # the "parallel" axis can shard across both v7x TensorCores.
    if NC > base:
        half = max(base, ((NC + 1) // 2 // base) * base)
        if half < NC:
            b = min(b, half)
    if b >= NC:
        b = NC   # single full-extent block (always layout-legal)
    grid = pl.cdiv(NC, b)
    ragged = (grid * b) != NC
    # TODO(synk): planes larger than the per-block budget are not spatially tiled.

    kernel = functools.partial(
        _edge_loss_kernel, h=H, w=W, total_rows=NC * H, ragged=ragged)

    partials = pl.pallas_call(
        kernel,
        out_shape=jax.ShapeDtypeStruct((grid, 1, 1), jnp.float32),
        grid_spec=pltpu.PrefetchScalarGridSpec(
            num_scalar_prefetch=0,
            grid=(grid,),
            in_specs=[
                pl.BlockSpec((b * H, W), lambda i: (i, 0)),
                pl.BlockSpec((b * H, W), lambda i: (i, 0)),
            ],
            # Trailing (1, 1) dims equal the full array dims -> layout-legal;
            # the leading dim carries one independent partial per grid step.
            out_specs=pl.BlockSpec((1, 1, 1), lambda i: (i, 0, 0)),
        ),
        compiler_params=pltpu.CompilerParams(
            # Each step writes its own partial -> parallel axis is safe
            # (megacore sharding on v7x); the sum happens in the wrapper.
            dimension_semantics=("parallel",),
            vmem_limit_bytes=min(vmem_cap // 2, 64 * 1024 * 1024),
        ),
    )(x2, y2)

    n_elem = jnp.float32(N * C * H * W)   # conv outputs keep (N, C, H, W)
    return jnp.sum(partials) / n_elem


def _edge_loss_reference(x, y):
    """Pure-JAX reference (same math) for a sanity check."""
    kx = jnp.array([[1., 0., -1.], [2., 0., -2.], [1., 0., -1.]], jnp.float32)
    ky = jnp.array([[1., 2., 1.], [0., 0., 0.], [-1., -2., -1.]], jnp.float32)
    N, C, H, W = x.shape
    px = x.reshape(N * C, 1, H, W).astype(jnp.float32)
    py = y.reshape(N * C, 1, H, W).astype(jnp.float32)

    def conv(p, k):
        return jax.lax.conv_general_dilated(
            p, k.reshape(1, 1, 3, 3), window_strides=(1, 1),
            padding=((1, 1), (1, 1)),
            dimension_numbers=("NCHW", "OIHW", "NCHW"))

    mse = lambda a, b: jnp.mean((a - b) ** 2)
    return (mse(px, py)
            + 0.5 * (mse(conv(px, kx), conv(py, kx))
                     + mse(conv(px, ky), conv(py, ky))))


if __name__ == "__main__":
    key = jax.random.PRNGKey(0)
    k1, k2, k3, k4, k5, k6 = jax.random.split(key, 6)

    # Case 1: canonical module shape (channels == batch); auto block sizing,
    # b capped so grid >= 2 (both v7x TensorCores get work).
    x1 = jax.random.normal(k1, (2, 2, 16, 16), dtype=jnp.float32)
    y1 = jax.random.normal(k2, (2, 2, 16, 16), dtype=jnp.float32)
    loss1 = jax.block_until_ready(edge_loss(x1, y1))
    ref1 = jax.block_until_ready(_edge_loss_reference(x1, y1))
    assert jnp.allclose(loss1, ref1, rtol=1e-4, atol=1e-4), (loss1, ref1)

    # Case 2: ragged plane count (9 planes, 2 per step) -> in-kernel tail
    # masking path (no jnp.pad HBM copy).
    x2 = jax.random.normal(k3, (3, 3, 16, 24), dtype=jnp.float32)
    y2 = jax.random.normal(k4, (3, 3, 16, 24), dtype=jnp.float32)
    loss2 = jax.block_until_ready(edge_loss(x2, y2, block_planes=2))
    ref2 = jax.block_until_ready(_edge_loss_reference(x2, y2))
    assert jnp.allclose(loss2, ref2, rtol=1e-4, atol=1e-4), (loss2, ref2)

    # Case 3: bf16 inputs (DMA'd as bf16, cast to f32 inside the kernel).
    x3 = jax.random.normal(k5, (2, 2, 16, 16), dtype=jnp.float32).astype(jnp.bfloat16)
    y3 = jax.random.normal(k6, (2, 2, 16, 16), dtype=jnp.float32).astype(jnp.bfloat16)
    loss3 = jax.block_until_ready(edge_loss(x3, y3))
    ref3 = jax.block_until_ready(_edge_loss_reference(x3, y3))
    assert jnp.allclose(loss3, ref3, rtol=2e-3, atol=2e-3), (loss3, ref3)

    print("KERNEL_OK")
</pallas_src>

<mosaic_0001>
module attributes {stable_mosaic.version = 11 : i64} {
  func.func @_edge_loss_kernel(%arg0: i32, %arg1: memref<32x16xf32, #tpu.memory_space<vmem>>, %arg2: memref<32x16xf32, #tpu.memory_space<vmem>>, %arg3: memref<1x1x1xf32, #tpu.memory_space<vmem>>) attributes {dimension_semantics = [#tpu.dimension_semantics<parallel>], iteration_bounds = array<i64: 2>, scalar_prefetch = 0 : i64, scratch_operands = 0 : i64, tpu.core_type = #tpu.core_type<tc>, window_params = [{transform_indices = @transform_0, window_bounds = array<i64: 32, 16>}, {transform_indices = @transform_1, window_bounds = array<i64: 32, 16>}, {transform_indices = @transform_2, window_bounds = array<i64: 1, 1, 1>}]} {
    %c0 = arith.constant 0 : index
    %c0_0 = arith.constant 0 : index
    %0 = vector.load %arg1[%c0, %c0_0] : memref<32x16xf32, #tpu.memory_space<vmem>>, vector<32x16xf32>
    %c0_1 = arith.constant 0 : index
    %c0_2 = arith.constant 0 : index
    %1 = vector.load %arg2[%c0_1, %c0_2] : memref<32x16xf32, #tpu.memory_space<vmem>>, vector<32x16xf32>
    %2 = arith.subf %0, %1 : vector<32x16xf32>
    %3 = tpu.iota {dimensions = array<i32: 0>} : vector<32x1xi32>
    %4 = tpu.iota {dimensions = array<i32: 1>} : vector<1x16xi32>
    %c16_i32 = arith.constant 16 : i32
    %c0_i32 = arith.constant 0 : i32
    %5 = arith.cmpi eq, %c16_i32, %c0_i32 : i32
    %c1_i32 = arith.constant 1 : i32
    %6 = arith.select %5, %c1_i32, %c16_i32 : i32
    %7 = vector.broadcast %6 : i32 to vector<32x1xi32>
    %8 = arith.remsi %3, %7 : vector<32x1xi32>
    %c0_i32_3 = arith.constant 0 : i32
    %9 = vector.broadcast %c0_i32_3 : i32 to vector<32x1xi32>
    %10 = arith.cmpi ne, %8, %9 : vector<32x1xi32>
    %c0_i32_4 = arith.constant 0 : i32
    %11 = vector.broadcast %c0_i32_4 : i32 to vector<32x1xi32>
    %12 = arith.cmpi slt, %8, %11 : vector<32x1xi32>
    %c0_i32_5 = arith.constant 0 : i32
    %13 = arith.cmpi slt, %6, %c0_i32_5 : i32
    %14 = vector.broadcast %13 : i1 to vector<32x1xi1>
    %15 = vector.broadcast %14 : vector<32x1xi1> to vector<32x1xi1>
    %16 = arith.xori %12, %15 : vector<32x1xi1>
    %17 = arith.andi %16, %10 : vector<32x1xi1>
    %18 = vector.broadcast %6 : i32 to vector<32x1xi32>
    %19 = arith.addi %8, %18 : vector<32x1xi32>
    %20 = arith.select %17, %19, %8 : vector<32x1xi1>, vector<32x1xi32>
    %c0_i32_6 = arith.constant 0 : i32
    %21 = vector.broadcast %c0_i32_6 : i32 to vector<32x1xi32>
    %22 = arith.cmpi ne, %20, %21 : vector<32x1xi32>
    %c15_i32 = arith.constant 15 : i32
    %23 = vector.broadcast %c15_i32 : i32 to vector<32x1xi32>
    %24 = arith.cmpi ne, %20, %23 : vector<32x1xi32>
    %c0_i32_7 = arith.constant 0 : i32
    %25 = vector.broadcast %c0_i32_7 : i32 to vector<1x16xi32>
    %26 = arith.cmpi ne, %4, %25 : vector<1x16xi32>
    %c15_i32_8 = arith.constant 15 : i32
    %27 = vector.broadcast %c15_i32_8 : i32 to vector<1x16xi32>
    %28 = arith.cmpi ne, %4, %27 : vector<1x16xi32>
    %c1_i32_9 = arith.constant 1 : i32
    %29 = tpu.dynamic_rotate %2 by %c1_i32_9 dim 0 : vector<32x16xf32>, i32 -> vector<32x16xf32>
    %cst = arith.constant 0.000000e+00 : f32
    %30 = vector.shape_cast %22 : vector<32x1xi1> to vector<32x1xi1>
    %31 = vector.broadcast %30 : vector<32x1xi1> to vector<32x16xi1>
    %32 = vector.broadcast %cst : f32 to vector<32x16xf32>
    %33 = arith.select %31, %29, %32 : vector<32x16xi1>, vector<32x16xf32>
    %c31_i32 = arith.constant 31 : i32
    %34 = tpu.dynamic_rotate %2 by %c31_i32 dim 0 : vector<32x16xf32>, i32 -> vector<32x16xf32>
    %cst_10 = arith.constant 0.000000e+00 : f32
    %35 = vector.shape_cast %24 : vector<32x1xi1> to vector<32x1xi1>
    %36 = vector.broadcast %35 : vector<32x1xi1> to vector<32x16xi1>
    %37 = vector.broadcast %cst_10 : f32 to vector<32x16xf32>
    %38 = arith.select %36, %34, %37 : vector<32x16xi1>, vector<32x16xf32>
    %cst_11 = arith.constant 2.000000e+00 : f32
    %39 = vector.broadcast %cst_11 : f32 to vector<32x16xf32>
    %40 = arith.mulf %39, %2 : vector<32x16xf32>
    %41 = arith.addf %33, %40 : vector<32x16xf32>
    %42 = arith.addf %41, %38 : vector<32x16xf32>
    %c1_i32_12 = arith.constant 1 : i32
    %43 = tpu.dynamic_rotate %42 by %c1_i32_12 dim 1 : vector<32x16xf32>, i32 -> vector<32x16xf32>
    %cst_13 = arith.constant 0.000000e+00 : f32
    %44 = vector.shape_cast %26 : vector<1x16xi1> to vector<1x16xi1>
    %45 = vector.broadcast %44 : vector<1x16xi1> to vector<32x16xi1>
    %46 = vector.broadcast %cst_13 : f32 to vector<32x16xf32>
    %47 = arith.select %45, %43, %46 : vector<32x16xi1>, vector<32x16xf32>
    %c15_i32_14 = arith.constant 15 : i32
    %48 = tpu.dynamic_rotate %42 by %c15_i32_14 dim 1 : vector<32x16xf32>, i32 -> vector<32x16xf32>
    %cst_15 = arith.constant 0.000000e+00 : f32
    %49 = vector.shape_cast %28 : vector<1x16xi1> to vector<1x16xi1>
    %50 = vector.broadcast %49 : vector<1x16xi1> to vector<32x16xi1>
    %51 = vector.broadcast %cst_15 : f32 to vector<32x16xf32>
    %52 = arith.select %50, %48, %51 : vector<32x16xi1>, vector<32x16xf32>
    %53 = arith.subf %47, %52 : vector<32x16xf32>
    %54 = arith.mulf %2, %2 : vector<32x16xf32>
    %55 = arith.mulf %53, %53 : vector<32x16xf32>
    %cst_16 = arith.constant 5.000000e-01 : f32
    %56 = vector.broadcast %cst_16 : f32 to vector<32x16xf32>
    %57 = arith.mulf %56, %55 : vector<32x16xf32>
    %58 = arith.addf %54, %57 : vector<32x16xf32>
    %59 = arith.subf %33, %38 : vector<32x16xf32>
    %c1_i32_17 = arith.constant 1 : i32
    %60 = tpu.dynamic_rotate %59 by %c1_i32_17 dim 1 : vector<32x16xf32>, i32 -> vector<32x16xf32>
    %cst_18 = arith.constant 0.000000e+00 : f32
    %61 = vector.shape_cast %26 : vector<1x16xi1> to vector<1x16xi1>
    %62 = vector.broadcast %61 : vector<1x16xi1> to vector<32x16xi1>
    %63 = vector.broadcast %cst_18 : f32 to vector<32x16xf32>
    %64 = arith.select %62, %60, %63 : vector<32x16xi1>, vector<32x16xf32>
    %c15_i32_19 = arith.constant 15 : i32
    %65 = tpu.dynamic_rotate %59 by %c15_i32_19 dim 1 : vector<32x16xf32>, i32 -> vector<32x16xf32>
    %cst_20 = arith.constant 0.000000e+00 : f32
    %66 = vector.shape_cast %28 : vector<1x16xi1> to vector<1x16xi1>
    %67 = vector.broadcast %66 : vector<1x16xi1> to vector<32x16xi1>
    %68 = vector.broadcast %cst_20 : f32 to vector<32x16xf32>
    %69 = arith.select %67, %65, %68 : vector<32x16xi1>, vector<32x16xf32>
    %cst_21 = arith.constant 2.000000e+00 : f32
    %70 = vector.broadcast %cst_21 : f32 to vector<32x16xf32>
    %71 = arith.mulf %70, %59 : vector<32x16xf32>
    %72 = arith.addf %64, %71 : vector<32x16xf32>
    %73 = arith.addf %72, %69 : vector<32x16xf32>
    %74 = arith.mulf %73, %73 : vector<32x16xf32>
    %cst_22 = arith.constant 5.000000e-01 : f32
    %75 = vector.broadcast %cst_22 : f32 to vector<32x16xf32>
    %76 = arith.mulf %75, %74 : vector<32x16xf32>
    %77 = arith.addf %58, %76 : vector<32x16xf32>
    %78 = vector.shape_cast %77 : vector<32x16xf32> to vector<1x32x16xf32>
    %cst_23 = arith.constant dense<0.000000e+00> : vector<1xf32>
    %79 = vector.multi_reduction <add>, %78, %cst_23 [1, 2] : vector<1x32x16xf32> to vector<1xf32>
    %80 = vector.shape_cast %79 : vector<1xf32> to vector<1x1x1xf32>
    %81 = vector.extract %80[0, 0, 0] : f32 from vector<1x1x1xf32>
    %82 = vector.broadcast %81 : f32 to vector<1x1x1xf32>
    %c0_24 = arith.constant 0 : index
    %c0_25 = arith.constant 0 : index
    %c0_26 = arith.constant 0 : index
    %83 = vector.load %arg3[%c0_24, %c0_25, %c0_26] : memref<1x1x1xf32, #tpu.memory_space<vmem>>, vector<1x1x1xf32>
    tpu.vector_store %arg3[%c0_24, %c0_25, %c0_26], %82 {strides = array<i32>} : memref<1x1x1xf32, #tpu.memory_space<vmem>>, vector<1x1x1xf32>,
    return
  }
  func.func @transform_0(%arg0: i32) -> (i32, i32) {
    %c0_i32 = arith.constant 0 : i32
    %c0_i32_0 = arith.constant 0 : i32
    return %arg0, %c0_i32 : i32, i32
  }
  func.func @transform_1(%arg0: i32) -> (i32, i32) {
    %c0_i32 = arith.constant 0 : i32
    %c0_i32_0 = arith.constant 0 : i32
    return %arg0, %c0_i32 : i32, i32
  }
  func.func @transform_2(%arg0: i32) -> (i32, i32, i32) {
    %c0_i32 = arith.constant 0 : i32
    %c0_i32_0 = arith.constant 0 : i32
    %c0_i32_1 = arith.constant 0 : i32
    return %arg0, %c0_i32, %c0_i32_0 : i32, i32, i32
  }
}

</mosaic_0001>

<bundles_post_ra>
// kernel: tpu_custom_call.1
= control target key start
LH: loop header
LB: loop body
LE: loop exit
PB: predicated region body
PF: predicated region fallthrough
CT: control target
= control target key end

     0   :  { %s597_s9 = smov 0   ;;  %s800_s0 = inlined_call_operand.vmem [shape: f32[64,16], index: 0, kind: input, shape index: {}]   ;;  %s801_s1 = inlined_call_operand.vmem [shape: f32[64,16], index: 1, kind: input, shape index: {}]   ;;  %s802_s2 = inlined_call_operand.vmem [shape: f32[2,1,1], index: 2, kind: output, shape index: {}]  }
   0x1 LB: > { %s603_s10 = sadd.s32 4294967295, %s577_s9   ;;  %p551_p0 = scmp.ge.s32.totalorder %s577_s9, 1  ;;  %s577_s9 = sphi %s597_s9, %s12_s9  }
   0x2   : > { %p124_p1 = scmp.lt.s32.totalorder %s577_s9, 3 }
   0x4   : > { %p125_p2 = pnand %p551_p0, %p124_p1 }
   0x5   : > { %s552_s11 = sshll.u32 (!%p125_p2), %s603_s10, 2  ;;  %v176_v0 = vlaneseq (!%p125_p2)  ;;  %s579_s19 = smov (!%p125_p2), 16   ;;  %vm295_vm6 = vcmask (!%p125_p2), 1047680   ;;  %vm468_vm9 = vcmask (!%p125_p2), 130048   ;;  %vm486_vm10 = vcmask (!%p125_p2), 0  }
   0x6   : > { %128 = sbr.rel (%p125_p2) target bundleno = 627 (0x273), region = 28  ;;  %p150_p3 = scmp.lt.s32.totalorder (!%p125_p2), %s552_s11, 7 }
   0x7   : > { %v609_v1 = vshrl.u32 (!%p125_p2), %v176_v0, 7  ;;  %s580_s20 = smov (!%p125_p2), 113   ;;  %s581_s21 = smov (!%p125_p2), 127  }
   0x8   : > { %p161_p4 = scmp.lt.s32.totalorder (!%p125_p2), %s603_s10, 1 }
   0x9   : > { %v178_v2 = vadd.s32 (!%p125_p2), 8, %v609_v1  ;;  %v179_v3 = vadd.s32 (!%p125_p2), 16, %v609_v1  ;;  %v187_v4 = vand.u32 (!%p125_p2), 15, %v609_v1  ;;  %v180_v6 = vadd.s32 (!%p125_p2), 24, %v609_v1 }
   0xa   : > { %vm245_vm0 = vcmp.lt.s32.totalorder (!%p125_p2), %v609_v1, 1  ;;  %vm266_vm1 = vcmp.lt.s32.totalorder (!%p125_p2), %v609_v1, 7 }
   0xb   : > { %v194_v5 = vand.u32 (!%p125_p2), 15, %v178_v2  ;;  %v201_v18 = vand.u32 (!%p125_p2), 15, %v179_v3  ;;  %vm629_vm2 = vcmp.ne.s32.totalorder (!%p125_p2), %v187_v4, 0  ;;  %v208_v22 = vand.u32 (!%p125_p2), 15, %v180_v6 }
   0xd   : > { %s810_s11 = smov (!%p150_p3, %s552_s11), 7  ;;  %vm635_vm3 = vcmp.ne.s32.totalorder %v194_v5, 15  ;;  %vm651_vm4 = vcmp.ne.s32.totalorder %v201_v18, 0  ;;  %vm238_vm5 = vcmp.ne.s32.totalorder %v208_v22, 15  ;;  %s812_s10 = smov (!%p161_p4, %s603_s10), 1 }
   0xe   : > { %s553_s12 = sshll.u32 %s810_s11, 3  ;;  %s163_s24 = scalar_lea.vmem %s802_s2, %s812_s10 }
   0xf   : > { %s153_s15 = scalar_lea.vmem %s800_s0, %s553_s12  ;;  %s159_s18 = scalar_lea.vmem %s801_s1, %s553_s12 }
  0x10   : > { %v164_v7 = vld [vmem:[%s153_s15] sm:$0xff]  ;;  %v165_v8 = vld [vmem:[%s153_s15 + $0x8] sm:$0xff]  ;;  %v167_v9 = vld [vmem:[%s153_s15 + $0x18] sm:$0xff] }
  0x11   : > { %v168_v10 = vld [vmem:[%s159_s18] sm:$0xff]  ;;  %v169_v11 = vld [vmem:[%s159_s18 + $0x8] sm:$0xff]  ;;  %v171_v12 = vld [vmem:[%s159_s18 + $0x18] sm:$0xff] }
  0x12   : > { %v623_v13 = vsub.f32 %v164_v7, %v168_v10  ;;  %v625_v14 = vsub.f32 %v165_v8, %v169_v11  ;;  %v627_v15 = vsub.f32 %v167_v9, %v171_v12  ;;  %v166_v16 = vld [vmem:[%s153_s15 + $0x10] sm:$0xff] }
  0x13   : > { %v170_v17 = vld [vmem:[%s159_s18 + $0x10] sm:$0xff] }
  0x14   : > { %v633_v20 = vsub.f32 %v166_v16, %v170_v17  ;;  %v241_v23 = vrot.slane %v623_v13, 7  ;;  %v244_v24 = vrot.slane %v627_v15, 7  ;;  %v262_v25 = vrot.slane %v623_v13, 1 }
  0x15   : > { %v263_v26 = vrot.slane %v625_v14, 1  ;;  %v242_v27 = vrot.slane %v625_v14, 7  ;;  %v284_v29 = vmul.f32 2.0, %v625_v14  ;;  %v283_v34 = vmul.f32 2.0, %v623_v13 }
  0x16   : > { %v264_v28 = vrot.slane %v633_v20, 1  ;;  %v243_v30 = vrot.slane %v633_v20, 7  ;;  %v249_v31 = vsel %vm245_vm0, %v244_v24, %v241_v23  ;;  %v265_v38 = vrot.slane %v627_v15, 1 }
  0x17   : > { %v269_v32 = vsel %vm266_vm1, %v262_v25, %v263_v26  ;;  %v258_v35 = vsel %vm629_vm2, %v249_v31, 0.0  ;;  %v248_v36 = vsel %vm245_vm0, %v241_v23, %v242_v27  ;;  %v285_v44 = vmul.f32 2.0, %v633_v20 }
  0x18   : > { %v268_v37 = vsel %vm266_vm1, %v263_v26, %v264_v28  ;;  %v663_v39 = vsub.f32 %v258_v35, %v269_v32  ;;  %v288_v41 = vadd.f32 %v284_v29, %v248_v36  ;;  %v247_v42 = vsel %vm245_vm0, %v242_v27, %v243_v30 }
  0x19   : > { %v280_v40 = vsel %vm635_vm3, %v268_v37, 0.0  ;;  %v287_v43 = vadd.f32 %v283_v34, %v258_v35  ;;  %v260_v47 = vsel %vm651_vm4, %v247_v42, 0.0  ;;  %v267_v48 = vsel %vm266_vm1, %v264_v28, %v265_v38 }
  0x1a   : > { %384 = vrot.lane.b32.xlu1 %v663_v39, %s579_s19  ;;  %v672_v45 = vsub.f32 %v248_v36, %v280_v40  ;;  %v674_v46 = vadd.f32 %v288_v41, %v280_v40  ;;  %v289_v50 = vadd.f32 %v285_v44, %v260_v47  ;;  %v270_v51 = vsel %vm266_vm1, %v265_v38, %v262_v25 }
  0x1b   : > { %v682_v49 = vadd.f32 %v287_v43, %v269_v32  ;;  %v286_v52 = vmul.f32 2.0, %v627_v15  ;;  %v246_v53 = vsel %vm245_vm0, %v243_v30, %v244_v24  ;;  %v691_v54 = vsub.f32 %v260_v47, %v267_v48 }
  0x1c   : > { %299 = vrot.lane.b32.xlu0 %v674_v46, %s579_s19  ;;  %v282_v55 = vsel %vm238_vm5, %v270_v51, 0.0  ;;  %v293_v56 = vadd.f32 %v289_v50, %v267_v48  ;;  %v740_v36 = vand.u32 127, %v176_v0  ;;  %v444_v42 = vmul.f32 2.0, %v663_v39 }
  0x1d   : > { %v290_v57 = vadd.f32 %v286_v52, %v246_v53  ;;  %v697_v58 = vsub.f32 %v246_v53, %v282_v55  ;;  %v445_v44 = vmul.f32 2.0, %v672_v45 }
  0x1e   : > { %387 = vrot.lane.b32.xlu1 %v672_v45, %s579_s19  ;;  %vm239_vm7 = vcmp.ne.s32.totalorder %v740_v36, 0  ;;  %vm240_vm8 = vcmp.ne.s32.totalorder %v740_v36, 15 }
  0x1f   : > { %v294_v59 = vadd.f32 %v290_v57, %v282_v55 }
  0x20   : > { %296 = vrot.lane.b32.xlu0 %v682_v49, %s579_s19 }
  0x22   : > { %390 = vrot.lane.b32.xlu1 %v691_v54, %s579_s19 }
  0x24   : > { %302 = vrot.lane.b32.xlu0 %v293_v56, %s579_s19 }
  0x26   : > { %393 = vrot.lane.b32.xlu1 %v697_v58, %s579_s19 }
  0x28   : > { %305 = vrot.lane.b32.xlu0 %v294_v59, %s579_s19 }
  0x8c   : > { %v385_v60 = vpop.permute.xlu1 %384 }
  0x8d   : > { %v386_v61 = vsel %vm295_vm6, %v385_v60, %v663_v39 }
  0x8e   : > { %396 = vrot.lane.b32.xlu0 %v386_v61, %s579_s19  ;;  %v300_v62 = vpop.permute.xlu0 %299 }
  0x8f   : > { %v301_v9 = vsel %vm295_vm6, %v300_v62, %v674_v46  ;;  %v446_v62 = vmul.f32 2.0, %v691_v54 }
  0x90   : > { %v388_v63 = vpop.permute.xlu1 %387 }
  0x91   : > { %v389_v1 = vsel %vm295_vm6, %v388_v63, %v672_v45  ;;  %v365_v63 = vmul.f32 %v625_v14, %v625_v14 }
  0x92   : > { %398 = vrot.lane.b32.xlu1 %v389_v1, %s579_s19  ;;  %v297_v2 = vpop.permute.xlu0 %296 }
  0x93   : > { %v298_v3 = vsel %vm295_vm6, %v297_v2, %v682_v49 }
  0x94   : > { %v391_v4 = vpop.permute.xlu1 %390  ;;  %308 = vrot.lane.b32.xlu0 %v298_v3, %s579_s19  ;;  %v364_v3 = vmul.f32 %v623_v13, %v623_v13 }
  0x95   : > { %v392_v5 = vsel %vm295_vm6, %v391_v4, %v691_v54 }
  0x96   : > { %400 = vrot.lane.b32.xlu1 %v392_v5, %s579_s19  ;;  %v303_v6 = vpop.permute.xlu0 %302 }
  0x97   : > { %v304_v7 = vsel %vm295_vm6, %v303_v6, %v293_v56 }
  0x98   : > { %312 = vrot.lane.b32.xlu0 %v304_v7, %s579_s19  ;;  %v394_v8 = vpop.permute.xlu1 %393 }
  0x99   : > { %v395_v11 = vsel %vm295_vm6, %v394_v8, %v697_v58 }
  0x9a   : > { %310 = vrot.lane.b32.xlu1 %v301_v9, %s579_s19  ;;  %v306_v10 = vpop.permute.xlu0 %305 }
  0x9b   : > { %v307_v12 = vsel %vm295_vm6, %v306_v10, %v294_v59 }
  0x9c   : > { %314 = vrot.lane.b32.xlu0 %v307_v12, %s579_s19  ;;  %v447_v12 = vmul.f32 2.0, %v697_v58 }
  0x9e   : > { %402 = vrot.lane.b32.xlu1 %v395_v11, %s579_s19 }
 0x100   : > { %v397_v16 = vpop.permute.xlu0 %396 }
 0x101   : > { %v404_v17 = vsel %vm295_vm6, %v397_v16, %v663_v39 }
 0x102   : > { %412 = vrot.lane.b32.xlu0 %v404_v17, %s580_s20 }
 0x104   : > { %v399_v18 = vpop.permute.xlu1 %398 }
 0x105   : > { %v405_v19 = vsel %vm295_vm6, %v399_v18, %v672_v45 }
 0x106   : > { %414 = vrot.lane.b32.xlu1 %v405_v19, %s580_s20  ;;  %v309_v21 = vpop.permute.xlu0 %308 }
 0x107   : > { %v316_v31 = vsel %vm295_vm6, %v309_v21, %v682_v49 }
 0x108   : > { %v401_v22 = vpop.permute.xlu1 %400 }
 0x109   : > { %v406_v23 = vsel %vm295_vm6, %v401_v22, %v691_v54 }
 0x10a   : > { %428 = vrot.lane.b32.xlu1 %v404_v17, %s581_s21  ;;  %416 = vrot.lane.b32.xlu0 %v406_v23, %s580_s20  ;;  %v313_v24 = vpop.permute.xlu0 %312 }
 0x10b   : > { %v318_v32 = vsel %vm295_vm6, %v313_v24, %v293_v56 }
 0x10c   : > { %v311_v25 = vpop.permute.xlu1 %310 }
 0x10d   : > { %v317_v30 = vsel %vm295_vm6, %v311_v25, %v674_v46 }
 0x10e   : > { %430 = vrot.lane.b32.xlu0 %v405_v19, %s581_s21  ;;  %v315_v26 = vpop.permute.xlu0 %314 }
 0x10f   : > { %v319_v27 = vsel %vm295_vm6, %v315_v26, %v294_v59 }
 0x110   : > { %v403_v28 = vpop.permute.xlu1 %402 }
 0x111   : > { %v407_v29 = vsel %vm295_vm6, %v403_v28, %v697_v58 }
 0x112   : > { %418 = vrot.lane.b32.xlu1 %v407_v29, %s580_s20  ;;  %350 = vrot.lane.b32.xlu0 %v319_v27, %s581_s21 }
 0x116   : > { %328 = vrot.lane.b32.xlu1 %v317_v30, %s580_s20  ;;  %326 = vrot.lane.b32.xlu0 %v316_v31, %s580_s20 }
 0x11a   : > { %346 = vrot.lane.b32.xlu1 %v317_v30, %s581_s21  ;;  %344 = vrot.lane.b32.xlu0 %v316_v31, %s581_s21 }
 0x11e   : > { %330 = vrot.lane.b32.xlu0 %v318_v32, %s580_s20  ;;  %332 = vrot.lane.b32.xlu1 %v319_v27, %s580_s20 }
 0x122   : > { %432 = vrot.lane.b32.xlu0 %v406_v23, %s581_s21  ;;  %348 = vrot.lane.b32.xlu1 %v318_v32, %s581_s21 }
 0x126   : > { %434 = vrot.lane.b32.xlu1 %v407_v29, %s581_s21  ;;  %v366_v29 = vmul.f32 %v633_v20, %v633_v20 }
 0x174   : > { %v413_v33 = vpop.permute.xlu0 %412 }
 0x175   : > { %v424_v43 = vsel %vm239_vm7, %v413_v33, 0.0 }
 0x176   : > { %v448_v49 = vadd.f32 %v444_v42, %v424_v43 }
 0x178   : > { %v415_v34 = vpop.permute.xlu1 %414 }
 0x179   : > { %v425_v0 = vsel %vm239_vm7, %v415_v34, 0.0 }
 0x17a   : > { %v449_v39 = vadd.f32 %v445_v44, %v425_v0 }
 0x17c   : > { %v417_v35 = vpop.permute.xlu0 %416  ;;  %v429_v37 = vpop.permute.xlu1 %428 }
 0x17d   : > { %v440_v48 = vsel %vm240_vm8, %v429_v37, 0.0  ;;  %v426_v7 = vsel %vm239_vm7, %v417_v35, 0.0 }
 0x17e   : > { %v452_v51 = vadd.f32 %v448_v49, %v440_v48  ;;  %v450_v13 = vadd.f32 %v446_v62, %v426_v7 }
 0x180   : > { %v431_v38 = vpop.permute.xlu0 %430  ;;  %v456_v1 = vmul.f32 %v452_v51, %v452_v51 }
 0x181   : > { %v441_v50 = vsel %vm240_vm8, %v431_v38, 0.0  ;;  %v367_v38 = vmul.f32 %v627_v15, %v627_v15 }
 0x182   : > { %v453_v59 = vadd.f32 %v449_v39, %v441_v50  ;;  %v460_v16 = vmul.f32 0.5, %v456_v1 }
 0x184   : > { %v419_v40 = vpop.permute.xlu1 %418  ;;  %v351_v41 = vpop.permute.xlu0 %350  ;;  %v457_v9 = vmul.f32 %v453_v59, %v453_v59 }
 0x185   : > { %v359_v8 = vsel %vm240_vm8, %v351_v41, 0.0  ;;  %v427_v22 = vsel %vm239_vm7, %v419_v40, 0.0 }
 0x186   : > { %v461_v26 = vmul.f32 0.5, %v457_v9  ;;  %v451_v31 = vadd.f32 %v447_v12, %v427_v22 }
 0x188   : > { %v329_v46 = vpop.permute.xlu1 %328  ;;  %v327_v47 = vpop.permute.xlu0 %326 }
 0x189   : > { %v339_v55 = vsel %vm239_vm7, %v329_v46, 0.0  ;;  %v338_v45 = vsel %vm239_vm7, %v327_v47, 0.0 }
 0x18c   : > { %v347_v52 = vpop.permute.xlu1 %346  ;;  %v345_v53 = vpop.permute.xlu0 %344 }
 0x18d   : > { %v357_v56 = vsel %vm240_vm8, %v347_v52, 0.0  ;;  %v356_v57 = vsel %vm240_vm8, %v345_v53, 0.0 }
 0x18e   : > { %v361_v60 = vsub.f32 %v339_v55, %v357_v56  ;;  %v360_v61 = vsub.f32 %v338_v45, %v356_v57 }
 0x190   : > { %v369_v2 = vmul.f32 %v361_v60, %v361_v60  ;;  %v368_v4 = vmul.f32 %v360_v61, %v360_v61  ;;  %v333_v5 = vpop.permute.xlu1 %332  ;;  %v331_v6 = vpop.permute.xlu0 %330 }
 0x191   : > { %v341_v54 = vsel %vm239_vm7, %v333_v5, 0.0  ;;  %v340_v23 = vsel %vm239_vm7, %v331_v6, 0.0 }
 0x192   : > { %v373_v10 = vmul.f32 0.5, %v369_v2  ;;  %v372_v14 = vmul.f32 0.5, %v368_v4  ;;  %v363_v11 = vsub.f32 %v341_v54, %v359_v8 }
 0x194   : > { %v377_v17 = vadd.f32 %v373_v10, %v365_v63  ;;  %v376_v18 = vadd.f32 %v372_v14, %v364_v3  ;;  %v349_v19 = vpop.permute.xlu1 %348  ;;  %v433_v21 = vpop.permute.xlu0 %432  ;;  %v371_v58 = vmul.f32 %v363_v11, %v363_v11 }
 0x195   : > { %v358_v24 = vsel %vm240_vm8, %v349_v19, 0.0  ;;  %v442_v25 = vsel %vm240_vm8, %v433_v21, 0.0 }
 0x196   : > { %v362_v27 = vsub.f32 %v340_v23, %v358_v24  ;;  %v464_v28 = vadd.f32 %v460_v16, %v376_v18  ;;  %v454_v30 = vadd.f32 %v450_v13, %v442_v25  ;;  %v465_v32 = vadd.f32 %v461_v26, %v377_v17 }
 0x197   : > { %v375_v40 = vmul.f32 0.5, %v371_v58 }
 0x198   : > { %v370_v33 = vmul.f32 %v362_v27, %v362_v27  ;;  %v435_v34 = vpop.permute.xlu1 %434  ;;  %v458_v35 = vmul.f32 %v454_v30, %v454_v30  ;;  %v469_v43 = vsel %vm468_vm9, %v464_v28, 0.0  ;;  %v470_v47 = vsel %vm468_vm9, %v465_v32, 0.0 }
 0x199   : > { %v443_v37 = vsel %vm240_vm8, %v435_v34, 0.0  ;;  %v379_v0 = vadd.f32 %v375_v40, %v367_v38  ;;  %v471_v50 = vadd.f32 %v470_v47, %v469_v43 }
 0x19a   : > { %v374_v41 = vmul.f32 0.5, %v370_v33  ;;  %v455_v42 = vadd.f32 %v451_v31, %v443_v37  ;;  %v462_v20 = vmul.f32 0.5, %v458_v35 }
 0x19c   : > { %v378_v44 = vadd.f32 %v374_v41, %v366_v29  ;;  %v459_v46 = vmul.f32 %v455_v42, %v455_v42 }
 0x19e   : > { %v466_v48 = vadd.f32 %v462_v20, %v378_v44  ;;  %v463_v49 = vmul.f32 0.5, %v459_v46 }
 0x1a0   : > { %v467_v36 = vadd.f32 %v463_v49, %v379_v0  ;;  %v472_v39 = vsel %vm468_vm9, %v466_v48, 0.0 }
 0x1a1   : > { %v473_v15 = vadd.f32 %v472_v39, %v471_v50 }
 0x1a2   : > { %v474_v51 = vsel %vm468_vm9, %v467_v36, 0.0 }
 0x1a3   : > { %v475_v52 = vadd.f32 %v474_v51, %v473_v15 }
 0x1a5   : > { %476 = vadd.xlane.f32.xlu0 %v475_v52 }
 0x232   : > { %v477_v53 = vpop.xlane.xlu0 %476 }
 0x233   : > { %v478_v55 = vrot.slane %v477_v53, 4 }
 0x235   : > { %v479_v45 = vadd.f32 %v478_v55, %v477_v53 }
 0x237   : > { %v480_v56 = vrot.slane %v479_v45, 2 }
 0x239   : > { %v481_v57 = vadd.f32 %v480_v56, %v479_v45 }
 0x23b   : > { %v482_v59 = vrot.slane %v481_v57, 1 }
 0x23d   : > { %v483_v60 = vadd.f32 %v482_v59, %v481_v57 }
 0x23f   : > { %558 = vpush %v483_v60 }
 0x270   : > { %s559_s25 = spop %558 }
 0x271   : > { %v485_v61 = vstv %s559_s25 }
 0x272   : > { %487 = vst.msk [vmem:[%s163_s24] sm:$0x1] %vm486_vm10, %v485_v61 }
 0x273 PF: > { %s12_s9 = sadd.s32 1, %s577_s9  }
 0x274   : > { %p9_p5 = scmp.ge.s32.totalorder %s12_s9, 4  }
 0x276   :  { %11 = sbr.rel (!%p9_p5) target bundleno = 1 (0x1), region = 61 }

</bundles_post_ra>
